<compile_context>
chip_gen: v6e
topology: v6e:2x2x1
jax: 0.10.0
libtpu: 0.0.40
codegen_flags: <defaults>
</compile_context>

<pallas_src>
import jax
import jax.numpy as jnp
from jax import lax
from jax.experimental import pallas as pl
from jax.experimental.pallas import tpu as pltpu

NUM_GROUPS = 32
GN_EPS = 1e-5
_K_ALIGN = 256                 # MXU contraction alignment (v6e/v7x); also 128 ok
_TILE_BUDGET_BYTES = 2 << 20   # per weight tile (double-buffered -> ~4 MiB max)


def _round_up(x, m):
    return ((x + m - 1) // m) * m


def _k_tiling(k, c, itemsize, tile_budget_bytes=_TILE_BUDGET_BYTES):
    """Return (k_pad, tile_k): tile_k is a 256-multiple within the VMEM budget,
    divides k_pad, and the number of grid steps k_pad // tile_k is minimal."""
    max_tk = max(_K_ALIGN,
                 (tile_budget_bytes // (c * itemsize)) // _K_ALIGN * _K_ALIGN)
    k_min = _round_up(k, _K_ALIGN)
    n_k = -(-k_min // max_tk)                       # ceil
    tile_k = _round_up(-(-k_min // n_k), _K_ALIGN)  # ceil, re-aligned
    return tile_k * n_k, tile_k


def _make_linear_groupnorm_kernel(tile_k):
    def kernel(x_ref, wt_ref, pkd_ref, oh2_ref, oht2_ref, o_ref):
        # x_ref:    [B, K_pad] bf16 resident activation
        # wt_ref:   [tile_k, C] bf16 streamed weight tile (pre-transposed)
        # pkd_ref:  [8, C]      f32  packed params: row0=bias, row1=gamma, row2=beta
        # oh2_ref:  [2C, G]     bf16 stacked one-hot (channel -> group), hi/lo halves
        # oht2_ref: [2G, C]     bf16 stacked one-hot transpose
        # o_ref:    [B, C]      f32  output; also the resident accumulator
        k = pl.program_id(0)
        nk = pl.num_programs(0)

        @pl.when(k == 0)
        def _init():
            o_ref[...] = jnp.zeros_like(o_ref)

        # Steady state: one MXU push per streamed weight tile, f32 accumulation
        # directly into the resident output block.
        start = pl.multiple_of(k * tile_k, _K_ALIGN)
        x_tile = x_ref[:, pl.ds(start, tile_k)]
        o_ref[...] += jnp.dot(x_tile, wt_ref[...],
                              preferred_element_type=jnp.float32)

        @pl.when(k == nk - 1)
        def _finalize():
            bias = pkd_ref[0:1, :]
            gamma = pkd_ref[1:2, :]
            beta = pkd_ref[2:3, :]

            y = o_ref[...] + bias                       # [B, C] f32
            c = y.shape[1]
            g = oh2_ref.shape[1]
            inv_gs = jnp.float32(1.0 / (c // g))

            oh2 = oh2_ref[...]                          # [2C, G] bf16 (0/1)
            oht2 = oht2_ref[...]                        # [2G, C] bf16 (0/1)

            def split_dot(a, b2):
                # ~bf16x2-accurate a @ one_hot, a single MXU push: split `a`
                # into bf16 hi + lo and contract both halves against the
                # host-stacked one-hot in one matmul.
                hi = a.astype(jnp.bfloat16)
                lo = (a - hi.astype(jnp.float32)).astype(jnp.bfloat16)
                return jnp.dot(jnp.concatenate([hi, lo], axis=1), b2,
                               preferred_element_type=jnp.float32)

            mean_g = split_dot(y, oh2) * inv_gs          # [B, G]
            mean_c = split_dot(mean_g, oht2)             # [B, C]
            d = y - mean_c
            var_g = split_dot(d * d, oh2) * inv_gs       # [B, G] two-pass var
            inv_c = split_dot(lax.rsqrt(var_g + GN_EPS), oht2)   # [B, C]
            o_ref[...] = (d * (inv_c * gamma) + beta).astype(o_ref.dtype)

    return kernel


def prepare_cond_avg_params(w, b, gamma, beta, num_groups=NUM_GROUPS,
                            weight_dtype=jnp.bfloat16):
    """One-time parameter prep: transpose, zero-pad K, cast weight to bf16,
    pack the affine params, and build the stacked one-hot group matrices.
    Keep the result and reuse it every call."""
    C, K = w.shape
    assert C % num_groups == 0, "cond_embed_dim must be divisible by 32"
    itemsize = jnp.dtype(weight_dtype).itemsize
    k_pad, _ = _k_tiling(K, C, itemsize)

    wt = w.T                                     # one-time transpose
    if k_pad > K:
        wt = jnp.pad(wt, ((0, k_pad - K), (0, 0)))   # zero rows: no-op in matmul
    wt = wt.astype(weight_dtype)                 # [K_pad, C]

    packed = jnp.zeros((8, C), jnp.float32)      # one (8,128)-tile resident input
    packed = packed.at[0].set(b.astype(jnp.float32))
    packed = packed.at[1].set(gamma.astype(jnp.float32))
    packed = packed.at[2].set(beta.astype(jnp.float32))

    gs = C // num_groups
    group_of_channel = jnp.arange(C, dtype=jnp.int32) // gs
    onehot = (group_of_channel[:, None]
              == jnp.arange(num_groups, dtype=jnp.int32)[None, :]
              ).astype(jnp.bfloat16)                          # [C, G], exact 0/1
    onehot2 = jnp.concatenate([onehot, onehot], axis=0)       # [2C, G]
    onehot_t2 = jnp.concatenate([onehot.T, onehot.T], axis=0)  # [2G, C]

    return {
        "wt": wt,                 # [K_pad, C] bf16
        "packed": packed,         # [8, C]     f32  (bias / gamma / beta)
        "onehot2": onehot2,       # [2C, G]    bf16
        "onehot_t2": onehot_t2,   # [2G, C]    bf16
    }


def cond_avg(cond, params):
    """cond: [B, S, F] float32 -> [B, C] float32 (Flatten -> Linear -> GroupNorm)."""
    B, S, F = cond.shape
    K = S * F
    wt = params["wt"]
    k_pad_w, C = wt.shape
    wbytes = jnp.dtype(wt.dtype).itemsize
    k_pad, tile_k = _k_tiling(K, C, wbytes)      # static ints (from shapes only)
    assert k_pad == k_pad_w, "params were prepared for a different K / dtype"
    n_k = k_pad // tile_k
    G = NUM_GROUPS

    x = cond.reshape(B, K)
    if k_pad > K:
        x = jnp.pad(x, ((0, 0), (0, k_pad - K)))
    x = x.astype(wt.dtype)                       # MXU-native bf16 activations

    cost = pl.CostEstimate(
        flops=2 * B * k_pad * C,
        transcendentals=B * G,
        bytes_accessed=(k_pad * C * wbytes + B * k_pad * wbytes
                        + B * C * 4 + 8 * C * 4 + 4 * C * G * 2))

    return pl.pallas_call(
        _make_linear_groupnorm_kernel(tile_k),
        out_shape=jax.ShapeDtypeStruct((B, C), jnp.float32),
        grid=(n_k,),
        in_specs=[
            pl.BlockSpec((B, k_pad), lambda k: (0, 0)),       # resident activation
            pl.BlockSpec((tile_k, C), lambda k: (k, 0)),      # streamed weight tile
            pl.BlockSpec((8, C), lambda k: (0, 0)),           # packed bias/gamma/beta
            pl.BlockSpec((2 * C, G), lambda k: (0, 0)),       # stacked one-hot
            pl.BlockSpec((2 * G, C), lambda k: (0, 0)),       # stacked one-hot^T
        ],
        out_specs=pl.BlockSpec((B, C), lambda k: (0, 0)),     # resident accumulator
        compiler_params=pltpu.CompilerParams(
            dimension_semantics=("arbitrary",)),
        cost_estimate=cost,
    )(x, wt, params["packed"], params["onehot2"], params["onehot_t2"])


def _reference_bf16(cond, w, b, gamma, beta, num_groups=NUM_GROUPS):
    """Pure-JAX reference with the kernel's numerics (bf16 weights/activations)."""
    B = cond.shape[0]
    C = w.shape[0]
    x = cond.reshape(B, -1).astype(jnp.bfloat16)
    wt = w.T.astype(jnp.bfloat16)
    y = jnp.dot(x, wt, preferred_element_type=jnp.float32) + b
    gs = C // num_groups
    yg = y.reshape(B, num_groups, gs)
    mean = yg.mean(axis=-1, keepdims=True)
    var = ((yg - mean) ** 2).mean(axis=-1, keepdims=True)
    yn = ((yg - mean) * lax.rsqrt(var + GN_EPS)).reshape(B, C)
    return yn * gamma + beta


def _reference_f32(cond, w, b, gamma, beta, num_groups=NUM_GROUPS):
    """Full-f32 reference matching the PyTorch module's semantics."""
    B = cond.shape[0]
    C = w.shape[0]
    x = cond.reshape(B, -1).astype(jnp.float32)
    y = jnp.dot(x, w.T.astype(jnp.float32),
                precision=lax.Precision.HIGHEST) + b
    gs = C // num_groups
    yg = y.reshape(B, num_groups, gs)
    mean = yg.mean(axis=-1, keepdims=True)
    var = ((yg - mean) ** 2).mean(axis=-1, keepdims=True)
    yn = ((yg - mean) * lax.rsqrt(var + GN_EPS)).reshape(B, C)
    return yn * gamma + beta


# TODO(synk): `self.diffusion` (LatentDiffusion), `self.schedule_sampler`,
# the checkpoint-loaded autoencoder `self.embed_` (encode/decode) and the
# abstract `forward` have no in-script Pallas equivalent.

if __name__ == "__main__":
    key = jax.random.PRNGKey(0)
    batch = 2                # NOTE: callers should stack conds so B >= 8 when possible
    seq_len = 750            # fixed by nn.Linear(emb_size * 750, ...)
    emb_size = 4
    cond_embed_dim = 128     # divisible by 32 (GroupNorm) and lane-dense (128)
    K = emb_size * seq_len

    k1, k2, k3 = jax.random.split(key, 3)
    cond = jax.random.normal(k1, (batch, seq_len, emb_size), dtype=jnp.float32)
    bound = 1.0 / (K ** 0.5)   # PyTorch-like init scale
    w = jax.random.uniform(k2, (cond_embed_dim, K), minval=-bound, maxval=bound,
                           dtype=jnp.float32)
    b = jax.random.uniform(k3, (cond_embed_dim,), minval=-bound, maxval=bound,
                           dtype=jnp.float32)
    gamma = jnp.ones((cond_embed_dim,), jnp.float32)    # GroupNorm affine init
    beta = jnp.zeros((cond_embed_dim,), jnp.float32)

    params = prepare_cond_avg_params(w, b, gamma, beta)   # one-time prep
    out = jax.jit(cond_avg)(cond, params)
    out = jax.block_until_ready(out)

    assert out.shape == (batch, cond_embed_dim)
    assert bool(jnp.all(jnp.isfinite(out))), "non-finite output"

    # Tight check vs a reference using the kernel's numerics (bf16 GEMM).
    ref16 = _reference_bf16(cond, w, b, gamma, beta)
    err16 = float(jnp.max(jnp.abs(out - ref16)))
    assert jnp.allclose(out, ref16, atol=2e-3, rtol=2e-3), (
        f"mismatch vs bf16-numerics reference, max abs err {err16:.3e}")

    # Looser semantic check vs the true f32 op (PyTorch Linear+GroupNorm).
    ref32 = _reference_f32(cond, w, b, gamma, beta)
    err32 = float(jnp.max(jnp.abs(out - ref32)))
    assert jnp.allclose(out, ref32, atol=5e-2, rtol=5e-2), (
        f"mismatch vs f32 reference, max abs err {err32:.3e}")

    print("KERNEL_OK")
</pallas_src>

<mosaic_0001>
module attributes {stable_mosaic.version = 11 : i64} {
  func.func @kernel(%arg0: i32, %arg1: memref<2x3072xbf16, #tpu.memory_space<vmem>>, %arg2: memref<3072x128xbf16, #tpu.memory_space<vmem>>, %arg3: memref<8x128xf32, #tpu.memory_space<vmem>>, %arg4: memref<256x32xbf16, #tpu.memory_space<vmem>>, %arg5: memref<64x128xbf16, #tpu.memory_space<vmem>>, %arg6: memref<2x128xf32, #tpu.memory_space<vmem>>) attributes {dimension_semantics = [#tpu.dimension_semantics<arbitrary>], iteration_bounds = array<i64: 1>, scalar_prefetch = 0 : i64, scratch_operands = 0 : i64, tpu.core_type = #tpu.core_type<tc>, window_params = [{pipeline_mode = #tpu.pipeline_mode<synchronous>, transform_indices = @transform_0, window_bounds = array<i64: 2, 3072>}, {transform_indices = @transform_1, window_bounds = array<i64: 3072, 128>}, {pipeline_mode = #tpu.pipeline_mode<synchronous>, transform_indices = @transform_2, window_bounds = array<i64: 8, 128>}, {pipeline_mode = #tpu.pipeline_mode<synchronous>, transform_indices = @transform_3, window_bounds = array<i64: 256, 32>}, {pipeline_mode = #tpu.pipeline_mode<synchronous>, transform_indices = @transform_4, window_bounds = array<i64: 64, 128>}, {pipeline_mode = #tpu.pipeline_mode<synchronous>, transform_indices = @transform_5, window_bounds = array<i64: 2, 128>}]} {
    %c0_i32 = arith.constant 0 : i32
    %0 = arith.cmpi eq, %arg0, %c0_i32 : i32
    %1 = arith.extui %0 : i1 to i32
    %c0_i32_0 = arith.constant 0 : i32
    %2 = arith.cmpi ne, %1, %c0_i32_0 : i32
    scf.if %2 {
      %cst_9 = arith.constant 0.000000e+00 : f32
      %15 = vector.broadcast %cst_9 : f32 to vector<2x128xf32>
      %c0_10 = arith.constant 0 : index
      %c0_11 = arith.constant 0 : index
      %16 = vector.load %arg6[%c0_10, %c0_11] : memref<2x128xf32, #tpu.memory_space<vmem>>, vector<2x128xf32>
      tpu.vector_store %arg6[%c0_10, %c0_11], %15 {strides = array<i32>} : memref<2x128xf32, #tpu.memory_space<vmem>>, vector<2x128xf32>,
    } else {
    }
    %c3072_i32 = arith.constant 3072 : i32
    %3 = arith.muli %arg0, %c3072_i32 : i32
    %4 = tpu.assume_multiple %3, 256 : i32
    %c0 = arith.constant 0 : index
    %5 = arith.index_cast %4 : i32 to index
    %6 = vector.load %arg1[%c0, %5] : memref<2x3072xbf16, #tpu.memory_space<vmem>>, vector<2x3072xbf16>
    %c0_1 = arith.constant 0 : index
    %c0_2 = arith.constant 0 : index
    %7 = vector.load %arg6[%c0_1, %c0_2] : memref<2x128xf32, #tpu.memory_space<vmem>>, vector<2x128xf32>
    %c0_3 = arith.constant 0 : index
    %c0_4 = arith.constant 0 : index
    %8 = vector.load %arg2[%c0_3, %c0_4] : memref<3072x128xbf16, #tpu.memory_space<vmem>>, vector<3072x128xbf16>
    %cst = arith.constant dense<0.000000e+00> : vector<2x128xf32>
    %9 = tpu.matmul %6, %8, %cst {dimension_numbers = #tpu.dot_dimension_numbers<[1], [0], [0], [1], [0, 0, 1, 1], [], []>} : vector<2x3072xbf16>, vector<3072x128xbf16>, vector<2x128xf32> -> vector<2x128xf32>
    %10 = arith.addf %7, %9 : vector<2x128xf32>
    %c0_5 = arith.constant 0 : index
    %c0_6 = arith.constant 0 : index
    %11 = vector.load %arg6[%c0_5, %c0_6] : memref<2x128xf32, #tpu.memory_space<vmem>>, vector<2x128xf32>
    tpu.vector_store %arg6[%c0_5, %c0_6], %10 {strides = array<i32>} : memref<2x128xf32, #tpu.memory_space<vmem>>, vector<2x128xf32>,
    %c0_i32_7 = arith.constant 0 : i32
    %12 = arith.cmpi eq, %arg0, %c0_i32_7 : i32
    %13 = arith.extui %12 : i1 to i32
    %c0_i32_8 = arith.constant 0 : i32
    %14 = arith.cmpi ne, %13, %c0_i32_8 : i32
    scf.if %14 {
      %c0_9 = arith.constant 0 : index
      %c0_10 = arith.constant 0 : index
      %15 = vector.load %arg3[%c0_9, %c0_10] : memref<8x128xf32, #tpu.memory_space<vmem>>, vector<1x128xf32>
      %c1 = arith.constant 1 : index
      %c0_11 = arith.constant 0 : index
      %16 = vector.load %arg3[%c1, %c0_11] : memref<8x128xf32, #tpu.memory_space<vmem>>, vector<1x128xf32>
      %c2 = arith.constant 2 : index
      %c0_12 = arith.constant 0 : index
      %17 = vector.load %arg3[%c2, %c0_12] : memref<8x128xf32, #tpu.memory_space<vmem>>, vector<1x128xf32>
      %c0_13 = arith.constant 0 : index
      %c0_14 = arith.constant 0 : index
      %18 = vector.load %arg6[%c0_13, %c0_14] : memref<2x128xf32, #tpu.memory_space<vmem>>, vector<2x128xf32>
      %19 = vector.broadcast %15 : vector<1x128xf32> to vector<2x128xf32>
      %20 = arith.addf %18, %19 : vector<2x128xf32>
      %c0_15 = arith.constant 0 : index
      %c0_16 = arith.constant 0 : index
      %21 = vector.load %arg4[%c0_15, %c0_16] : memref<256x32xbf16, #tpu.memory_space<vmem>>, vector<256x32xbf16>
      %c0_17 = arith.constant 0 : index
      %c0_18 = arith.constant 0 : index
      %22 = vector.load %arg5[%c0_17, %c0_18] : memref<64x128xbf16, #tpu.memory_space<vmem>>, vector<64x128xbf16>
      %23 = arith.truncf %20 : vector<2x128xf32> to vector<2x128xbf16>
      %24 = arith.extf %23 : vector<2x128xbf16> to vector<2x128xf32>
      %25 = arith.subf %20, %24 : vector<2x128xf32>
      %26 = arith.truncf %25 : vector<2x128xf32> to vector<2x128xbf16>
      %27 = tpu.concatenate %23, %26 in 1 : vector<2x128xbf16>, vector<2x128xbf16> -> vector<2x256xbf16>
      %cst_19 = arith.constant dense<0.000000e+00> : vector<2x32xf32>
      %28 = tpu.matmul %27, %21, %cst_19 {dimension_numbers = #tpu.dot_dimension_numbers<[1], [0], [0], [1], [0, 0, 1, 1], [], []>} : vector<2x256xbf16>, vector<256x32xbf16>, vector<2x32xf32> -> vector<2x32xf32>
      %cst_20 = arith.constant 2.500000e-01 : f32
      %29 = vector.broadcast %cst_20 : f32 to vector<2x32xf32>
      %30 = arith.mulf %28, %29 : vector<2x32xf32>
      %31 = arith.truncf %30 : vector<2x32xf32> to vector<2x32xbf16>
      %32 = arith.extf %31 : vector<2x32xbf16> to vector<2x32xf32>
      %33 = arith.subf %30, %32 : vector<2x32xf32>
      %34 = arith.truncf %33 : vector<2x32xf32> to vector<2x32xbf16>
      %35 = tpu.concatenate %31, %34 in 1 : vector<2x32xbf16>, vector<2x32xbf16> -> vector<2x64xbf16>
      %cst_21 = arith.constant dense<0.000000e+00> : vector<2x128xf32>
      %36 = tpu.matmul %35, %22, %cst_21 {dimension_numbers = #tpu.dot_dimension_numbers<[1], [0], [0], [1], [0, 0, 1, 1], [], []>} : vector<2x64xbf16>, vector<64x128xbf16>, vector<2x128xf32> -> vector<2x128xf32>
      %37 = arith.subf %20, %36 : vector<2x128xf32>
      %38 = arith.mulf %37, %37 : vector<2x128xf32>
      %39 = arith.truncf %38 : vector<2x128xf32> to vector<2x128xbf16>
      %40 = arith.extf %39 : vector<2x128xbf16> to vector<2x128xf32>
      %41 = arith.subf %38, %40 : vector<2x128xf32>
      %42 = arith.truncf %41 : vector<2x128xf32> to vector<2x128xbf16>
      %43 = tpu.concatenate %39, %42 in 1 : vector<2x128xbf16>, vector<2x128xbf16> -> vector<2x256xbf16>
      %cst_22 = arith.constant dense<0.000000e+00> : vector<2x32xf32>
      %44 = tpu.matmul %43, %21, %cst_22 {dimension_numbers = #tpu.dot_dimension_numbers<[1], [0], [0], [1], [0, 0, 1, 1], [], []>} : vector<2x256xbf16>, vector<256x32xbf16>, vector<2x32xf32> -> vector<2x32xf32>
      %cst_23 = arith.constant 2.500000e-01 : f32
      %45 = vector.broadcast %cst_23 : f32 to vector<2x32xf32>
      %46 = arith.mulf %44, %45 : vector<2x32xf32>
      %cst_24 = arith.constant 9.99999974E-6 : f32
      %47 = vector.broadcast %cst_24 : f32 to vector<2x32xf32>
      %48 = arith.addf %46, %47 : vector<2x32xf32>
      %49 = math.rsqrt %48 : vector<2x32xf32>
      %50 = arith.truncf %49 : vector<2x32xf32> to vector<2x32xbf16>
      %51 = arith.extf %50 : vector<2x32xbf16> to vector<2x32xf32>
      %52 = arith.subf %49, %51 : vector<2x32xf32>
      %53 = arith.truncf %52 : vector<2x32xf32> to vector<2x32xbf16>
      %54 = tpu.concatenate %50, %53 in 1 : vector<2x32xbf16>, vector<2x32xbf16> -> vector<2x64xbf16>
      %cst_25 = arith.constant dense<0.000000e+00> : vector<2x128xf32>
      %55 = tpu.matmul %54, %22, %cst_25 {dimension_numbers = #tpu.dot_dimension_numbers<[1], [0], [0], [1], [0, 0, 1, 1], [], []>} : vector<2x64xbf16>, vector<64x128xbf16>, vector<2x128xf32> -> vector<2x128xf32>
      %56 = vector.broadcast %16 : vector<1x128xf32> to vector<2x128xf32>
      %57 = arith.mulf %55, %56 : vector<2x128xf32>
      %58 = arith.mulf %37, %57 : vector<2x128xf32>
      %59 = vector.broadcast %17 : vector<1x128xf32> to vector<2x128xf32>
      %60 = arith.addf %58, %59 : vector<2x128xf32>
      %c0_26 = arith.constant 0 : index
      %c0_27 = arith.constant 0 : index
      %61 = vector.load %arg6[%c0_26, %c0_27] : memref<2x128xf32, #tpu.memory_space<vmem>>, vector<2x128xf32>
      tpu.vector_store %arg6[%c0_26, %c0_27], %60 {strides = array<i32>} : memref<2x128xf32, #tpu.memory_space<vmem>>, vector<2x128xf32>,
    } else {
    }
    return
  }
  func.func @transform_0(%arg0: i32) -> (i32, i32) {
    %c0_i32 = arith.constant 0 : i32
    %c0_i32_0 = arith.constant 0 : i32
    %c0_i32_1 = arith.constant 0 : i32
    return %c0_i32, %c0_i32_0 : i32, i32
  }
  func.func @transform_1(%arg0: i32) -> (i32, i32) {
    %c0_i32 = arith.constant 0 : i32
    %c0_i32_0 = arith.constant 0 : i32
    return %arg0, %c0_i32 : i32, i32
  }
  func.func @transform_2(%arg0: i32) -> (i32, i32) {
    %c0_i32 = arith.constant 0 : i32
    %c0_i32_0 = arith.constant 0 : i32
    %c0_i32_1 = arith.constant 0 : i32
    return %c0_i32, %c0_i32_0 : i32, i32
  }
  func.func @transform_3(%arg0: i32) -> (i32, i32) {
    %c0_i32 = arith.constant 0 : i32
    %c0_i32_0 = arith.constant 0 : i32
    %c0_i32_1 = arith.constant 0 : i32
    return %c0_i32, %c0_i32_0 : i32, i32
  }
  func.func @transform_4(%arg0: i32) -> (i32, i32) {
    %c0_i32 = arith.constant 0 : i32
    %c0_i32_0 = arith.constant 0 : i32
    %c0_i32_1 = arith.constant 0 : i32
    return %c0_i32, %c0_i32_0 : i32, i32
  }
  func.func @transform_5(%arg0: i32) -> (i32, i32) {
    %c0_i32 = arith.constant 0 : i32
    %c0_i32_0 = arith.constant 0 : i32
    %c0_i32_1 = arith.constant 0 : i32
    return %c0_i32, %c0_i32_0 : i32, i32
  }
}

</mosaic_0001>

<bundles_post_ra>
// kernel: cond_avg.1
= control target key start
LH: loop header
LB: loop body
LE: loop exit
PB: predicated region body
PF: predicated region fallthrough
CT: control target
= control target key end

     0   :  { %v426_v28 = vlaneseq  ;;  %v3429_v36 = vmov 1966171168   ;;  %s4237_s0 = inlined_call_operand.vmem [shape: bf16[2,3072], index: 0, kind: input, shape index: {}]   ;;  %s4238_s1 = inlined_call_operand.vmem [shape: bf16[3072,128], index: 1, kind: input, shape index: {}]   ;;  %s4239_s2 = inlined_call_operand.vmem [shape: f32[8,128], index: 2, kind: input, shape index: {}]   ;;  %s4240_s3 = inlined_call_operand.vmem [shape: bf16[256,32], index: 3, kind: input, shape index: {}]   ;;  %s4241_s4 = inlined_call_operand.vmem [shape: bf16[64,128], index: 4, kind: input, shape index: {}]   ;;  %s4242_s5 = inlined_call_operand.hbm [shape: f32[2,128], index: 5, kind: output, shape index: {}]  }
   0x1   :  { %v3190_v0 = vld [vmem:[%s4238_s1 + $0x78] sm:$0xff]   ;;  %v3194_v4 = vld [vmem:[%s4238_s1 + $0x70] sm:$0xff]   ;;  %v3198_v8 = vld [vmem:[%s4238_s1 + $0x68] sm:$0xff]   ;;  %v424_v37 = vunpack.c.l.s4 %v3429_v36 }
   0x2   :  { %v3191_v1 = vld [vmem:[%s4238_s1 + $0xf8] sm:$0xff]   ;;  %2843 = vmatprep.subr.bf16.mxu0 %v3190_v0  ;;  %v3195_v5 = vld [vmem:[%s4238_s1 + $0xf0] sm:$0xff]   ;;  %v3199_v9 = vld [vmem:[%s4238_s1 + $0xe8] sm:$0xff]   ;;  %v427_v33 = vshrl.u32 %v426_v28, 7 }
   0x3   :  { %v3192_v2 = vld [vmem:[%s4238_s1 + $0x38] sm:$0xff]   ;;  %2865 = vmatprep.subr.bf16.mxu1 %v3191_v1  ;;  %v3196_v6 = vld [vmem:[%s4238_s1 + $0x30] sm:$0xff]   ;;  %v3200_v10 = vld [vmem:[%s4238_s1 + $0x28] sm:$0xff]   ;;  %v425_v40 = vunpack.c.0.s8 %v424_v37 }
   0x4   :  { %v3193_v3 = vld [vmem:[%s4238_s1 + $0xb8] sm:$0xff]   ;;  %2844 = vmatpush3.bf16.msra.mxu0 %v3192_v2  ;;  %v3197_v7 = vld [vmem:[%s4238_s1 + $0xb0] sm:$0xff]   ;;  %v3201_v11 = vld [vmem:[%s4238_s1 + $0xa8] sm:$0xff]  }
   0x5   :  { %2866 = vmatpush3.bf16.msra.mxu1 %v3193_v3  ;;  %2845 = vmatprep.subr.bf16.mxu0 %v3194_v4  ;;  %v3202_v12 = vld [vmem:[%s4238_s1 + $0x60] sm:$0xff]   ;;  %v3206_v16 = vld [vmem:[%s4238_s1 + $0x58] sm:$0xff]   ;;  %v3210_v20 = vld [vmem:[%s4238_s1 + $0x50] sm:$0xff]   ;;  %v3569_v41 = vsub.s32 %v425_v40, %v427_v33 }
   0x6   :  { %2867 = vmatprep.subr.bf16.mxu1 %v3195_v5  ;;  %v3203_v13 = vld [vmem:[%s4238_s1 + $0xe0] sm:$0xff]   ;;  %v3207_v17 = vld [vmem:[%s4238_s1 + $0xd8] sm:$0xff]   ;;  %v3211_v21 = vld [vmem:[%s4238_s1 + $0xd0] sm:$0xff]  }
   0x7   :  { %v3204_v14 = vld [vmem:[%s4238_s1 + $0x20] sm:$0xff]   ;;  %v3208_v18 = vld [vmem:[%s4238_s1 + $0x18] sm:$0xff]   ;;  %v3212_v22 = vld [vmem:[%s4238_s1 + $0x10] sm:$0xff]  }
   0x8   :  { %2846 = vmatpush3.bf16.msra.mxu0 %v3196_v6  ;;  %v3205_v15 = vld [vmem:[%s4238_s1 + $0xa0] sm:$0xff]   ;;  %v3209_v19 = vld [vmem:[%s4238_s1 + $0x98] sm:$0xff]   ;;  %v3213_v23 = vld [vmem:[%s4238_s1 + $0x90] sm:$0xff]  }
   0x9   :  { %2868 = vmatpush3.bf16.msra.mxu1 %v3197_v7  ;;  %2847 = vmatprep.subr.bf16.mxu0 %v3198_v8  ;;  %v3214_v24 = vld [vmem:[%s4238_s1 + $0x48] sm:$0xff]   ;;  %v3218_v29 = vld [vmem:[%s4238_s1 + $0x40] sm:$0xff]   ;;  %v3223_v35 = vld [vmem:[%s4238_s1 + $0x178] sm:$0xff]  }
   0xa   :  { %2869 = vmatprep.subr.bf16.mxu1 %v3199_v9  ;;  %v3215_v25 = vld [vmem:[%s4238_s1 + $0xc8] sm:$0xff]   ;;  %v3219_v30 = vld [vmem:[%s4238_s1 + $0xc0] sm:$0xff]   ;;  %v3224_v38 = vld [vmem:[%s4238_s1 + $0x1f8] sm:$0xff]  }
   0xb   :  { %v3216_v26 = vld [vmem:[%s4238_s1 + $0x8] sm:$0xff]   ;;  %v3220_v31 = vld [vmem:[%s4238_s1] sm:$0xff]   ;;  %v3225_v47 = vld [vmem:[%s4238_s1 + $0x138] sm:$0xff]  }
   0xc   :  { %2848 = vmatpush3.bf16.msra.mxu0 %v3200_v10  ;;  %v3217_v27 = vld [vmem:[%s4238_s1 + $0x88] sm:$0xff]   ;;  %v3221_v32 = vld [vmem:[%s4238_s1 + $0x80] sm:$0xff]   ;;  %v3226_v49 = vld [vmem:[%s4238_s1 + $0x1b8] sm:$0xff]  }
   0xd   :  { %2870 = vmatpush3.bf16.msra.mxu1 %v3201_v11  ;;  %2849 = vmatprep.subr.bf16.mxu0 %v3202_v12  ;;  %v31_v34 = vld [vmem:[%s4237_s0] sm:$0xff]  ;;  %v3227_v52 = vld [vmem:[%s4238_s1 + $0x170] sm:$0xff]   ;;  %v3231_v58 = vld [vmem:[%s4238_s1 + $0x168] sm:$0xff]  }
   0xe   :  { %2871 = vmatprep.subr.bf16.mxu1 %v3203_v13  ;;  %v422_v39 = vcombine.high %v31_v34, %v31_v34  ;;  %v429_v42 = vrot.slane %v31_v34, %v3569_v41  ;;  %v3228_v54 = vld [vmem:[%s4238_s1 + $0x1f0] sm:$0xff]   ;;  %v3232_v59 = vld [vmem:[%s4238_s1 + $0x1e8] sm:$0xff]   ;;  %v3235_v62 = vld [vmem:[%s4238_s1 + $0x160] sm:$0xff]  }
   0xf   :  { %v3229_v55 = vld [vmem:[%s4238_s1 + $0x130] sm:$0xff]   ;;  %v3233_v60 = vld [vmem:[%s4238_s1 + $0x128] sm:$0xff]   ;;  %v3236_v63 = vld [vmem:[%s4238_s1 + $0x1e0] sm:$0xff]  }
  0x10   :  { %2850 = vmatpush3.bf16.msra.mxu0 %v3204_v14  ;;  %v3573_v43 = vrot.slane %v422_v39, %v3569_v41  ;;  %v437_v44 = vcombine.high %v429_v42, %v429_v42  ;;  %v445_v45 = vrot.slane %v429_v42, %v3569_v41  ;;  %v3230_v57 = vld [vmem:[%s4238_s1 + $0x1b0] sm:$0xff]   ;;  %v3234_v61 = vld [vmem:[%s4238_s1 + $0x1a8] sm:$0xff]   ;;  %v3237_v0 = vld [vmem:[%s4238_s1 + $0x120] sm:$0xff]  }
  0x11   :  { %2872 = vmatpush3.bf16.msra.mxu1 %v3205_v15  ;;  %2851 = vmatprep.subr.bf16.mxu0 %v3206_v16  ;;  %v3238_v1 = vld [vmem:[%s4238_s1 + $0x1a0] sm:$0xff]   ;;  %v3239_v2 = vld [vmem:[%s4238_s1 + $0x158] sm:$0xff]   ;;  %v3243_v6 = vld [vmem:[%s4238_s1 + $0x150] sm:$0xff]  }
  0x12   :  { %2873 = vmatprep.subr.bf16.mxu1 %v3207_v17  ;;  %v438_v46 = vcombine.high %v3573_v43, %v3573_v43  ;;  %v459_v48 = vrot.slane %v437_v44, %v3569_v41  ;;  %v467_v51 = vcombine.high %v445_v45, %v445_v45  ;;  %v3240_v3 = vld [vmem:[%s4238_s1 + $0x1d8] sm:$0xff]   ;;  %v3244_v7 = vld [vmem:[%s4238_s1 + $0x1d0] sm:$0xff]   ;;  %v3247_v10 = vld [vmem:[%s4238_s1 + $0x148] sm:$0xff]  }
  0x13   :  { %v3241_v4 = vld [vmem:[%s4238_s1 + $0x118] sm:$0xff]   ;;  %v3245_v8 = vld [vmem:[%s4238_s1 + $0x110] sm:$0xff]   ;;  %v3248_v11 = vld [vmem:[%s4238_s1 + $0x1c8] sm:$0xff]  }
  0x14   :  { %2852 = vmatpush3.bf16.msra.mxu0 %v3208_v18  ;;  %v466_v50 = vrot.slane %v438_v46, %v3569_v41  ;;  %1777 = vmatprep.mubr.bf16.mxu0 %v459_v48  ;;  %v469_v53 = vcombine.high %v459_v48, %v459_v48  ;;  %v3242_v5 = vld [vmem:[%s4238_s1 + $0x198] sm:$0xff]   ;;  %v3246_v9 = vld [vmem:[%s4238_s1 + $0x190] sm:$0xff]   ;;  %v3249_v12 = vld [vmem:[%s4238_s1 + $0x108] sm:$0xff]   ;;  %v452_v18 = vrot.slane %v3573_v43, %v3569_v41 }
  0x15   :  { %2874 = vmatpush3.bf16.msra.mxu1 %v3209_v19  ;;  %2853 = vmatprep.subr.bf16.mxu0 %v3210_v20  ;;  %v3250_v13 = vld [vmem:[%s4238_s1 + $0x188] sm:$0xff]   ;;  %v3251_v14 = vld [vmem:[%s4238_s1 + $0x140] sm:$0xff]   ;;  %v3255_v19 = vld [vmem:[%s4238_s1 + $0x278] sm:$0xff]  }
  0x16   :  { %2875 = vmatprep.subr.bf16.mxu1 %v3211_v21  ;;  %v470_v56 = vcombine.high %v466_v50, %v466_v50  ;;  %1817 = vmatprep.mubr.bf16.mxu1 %v469_v53  ;;  %v3252_v15 = vld [vmem:[%s4238_s1 + $0x1c0] sm:$0xff]   ;;  %v3256_v20 = vld [vmem:[%s4238_s1 + $0x2f8] sm:$0xff]   ;;  %v3263_v28 = vld [vmem:[%s4238_s1 + $0x268] sm:$0xff]  }
  0x17   :  { %v3253_v16 = vld [vmem:[%s4238_s1 + $0x100] sm:$0xff]   ;;  %v3257_v21 = vld [vmem:[%s4238_s1 + $0x238] sm:$0xff]   ;;  %v3275_v40 = vld [vmem:[%s4238_s1 + $0x250] sm:$0xff]  }
  0x18   :  { %2854 = vmatpush3.bf16.msra.mxu0 %v3212_v22  ;;  %v3254_v17 = vld [vmem:[%s4238_s1 + $0x180] sm:$0xff]   ;;  %v3258_v22 = vld [vmem:[%s4238_s1 + $0x2b8] sm:$0xff]   ;;  %v3276_v42 = vld [vmem:[%s4238_s1 + $0x2d0] sm:$0xff]  }
  0x19   :  { %2876 = vmatpush3.bf16.msra.mxu1 %v3213_v23  ;;  %2855 = vmatprep.subr.bf16.mxu0 %v3214_v24  ;;  %v468_v23 = vcombine.high %v452_v18, %v452_v18  ;;  %v3259_v24 = vld [vmem:[%s4238_s1 + $0x270] sm:$0xff]   ;;  %v3268_v33 = vld [vmem:[%s4238_s1 + $0x2e0] sm:$0xff]   ;;  %v3271_v36 = vld [vmem:[%s4238_s1 + $0x258] sm:$0xff]  }
  0x1a   :  { %2877 = vmatprep.subr.bf16.mxu1 %v3215_v25  ;;  %v3260_v25 = vld [vmem:[%s4238_s1 + $0x2f0] sm:$0xff]   ;;  %v3269_v34 = vld [vmem:[%s4238_s1 + $0x220] sm:$0xff]   ;;  %v3272_v37 = vld [vmem:[%s4238_s1 + $0x2d8] sm:$0xff]  }
  0x1b   :  { %v3274_v39 = vld [vmem:[%s4238_s1 + $0x298] sm:$0xff]   ;;  %v3277_v43 = vld [vmem:[%s4238_s1 + $0x210] sm:$0xff]   ;;  %v32_v46 = vld [vmem:[%s4237_s0 + $0x8] sm:$0xff] }
  0x1c   :  { %2856 = vmatpush3.bf16.msra.mxu0 %v3216_v26  ;;  %v3261_v26 = vld [vmem:[%s4238_s1 + $0x230] sm:$0xff]   ;;  %v478_v48 = vrot.slane %v32_v46, %v3569_v41 }
  0x1d   :  { %2878 = vmatpush3.bf16.msra.mxu1 %v3217_v27  ;;  %2857 = vmatprep.subr.bf16.mxu0 %v3218_v29  ;;  %v3262_v27 = vld [vmem:[%s4238_s1 + $0x2b0] sm:$0xff]   ;;  %v3264_v29 = vld [vmem:[%s4238_s1 + $0x2e8] sm:$0xff]  }
  0x1e   :  { %2879 = vmatprep.subr.bf16.mxu1 %v3219_v30  ;;  %v3265_v30 = vld [vmem:[%s4238_s1 + $0x228] sm:$0xff]   ;;  %v3278_v44 = vld [vmem:[%s4238_s1 + $0x290] sm:$0xff]  }
  0x20   :  { %2858 = vmatpush3.bf16.msra.mxu0 %v3220_v31  ;;  %v3266_v31 = vld [vmem:[%s4238_s1 + $0x2a8] sm:$0xff]  }
  0x21   :  { %2880 = vmatpush3.bf16.msra.mxu1 %v3221_v32  ;;  %2887 = vmatprep.subr.bf16.mxu0 %v3223_v35  ;;  %v3267_v32 = vld [vmem:[%s4238_s1 + $0x260] sm:$0xff]  }
  0x22   :  { %2909 = vmatprep.subr.bf16.mxu1 %v3224_v38  ;;  %v3270_v35 = vld [vmem:[%s4238_s1 + $0x2a0] sm:$0xff]   ;;  %v3273_v38 = vld [vmem:[%s4238_s1 + $0x218] sm:$0xff]  }
  0x23   :  { %1778 = vmatmul.mubr.bf16.vlgmr.msra.gmra.mxu0 %v445_v45  ;;  %v3279_v45 = vld [vmem:[%s4238_s1 + $0x248] sm:$0xff]  }
  0x24   :  { %2888 = vmatpush3.bf16.msra.mxu0 %v3225_v47  ;;  %1818 = vmatmul.mubr.bf16.vlgmr.msra.gmra.mxu1 %v467_v51  ;;  %v3280_v47 = vld [vmem:[%s4238_s1 + $0x2c8] sm:$0xff]  }
  0x25   :  { %2889 = vmatprep.subr.bf16.mxu0 %v3227_v52  ;;  %2910 = vmatpush3.bf16.msra.mxu1 %v3226_v49  ;;  %v471_v49 = vcombine.high %v32_v46, %v32_v46  ;;  %v3282_v51 = vld [vmem:[%s4238_s1 + $0x288] sm:$0xff]   ;;  %v486_v52 = vcombine.high %v478_v48, %v478_v48 }
  0x26   :  { %1857 = vmatprep.mubr.bf16.mxu0 %v466_v50  ;;  %2911 = vmatprep.subr.bf16.mxu1 %v3228_v54  ;;  %v3281_v50 = vld [vmem:[%s4238_s1 + $0x208] sm:$0xff]   ;;  %v3283_v54 = vld [vmem:[%s4238_s1 + $0x240] sm:$0xff]  }
  0x27   :  { %1897 = vmatprep.mubr.bf16.mxu1 %v470_v56  ;;  %v3761_v53 = vrot.slane %v471_v49, %v3569_v41  ;;  %v508_v56 = vrot.slane %v486_v52, %v3569_v41  ;;  %v3330_v46 = vld [vmem:[%s4238_s1 + $0x428] sm:$0xff]   ;;  %v3333_v49 = vld [vmem:[%s4238_s1 + $0x4e0] sm:$0xff]   ;;  %v3336_v52 = vld [vmem:[%s4238_s1 + $0x458] sm:$0xff]  }
  0x28   :  { %2890 = vmatpush3.bf16.msra.mxu0 %v3229_v55  ;;  %v3284_v55 = vld [vmem:[%s4238_s1 + $0x2c0] sm:$0xff]  }
  0x29   :  { %2891 = vmatprep.subr.bf16.mxu0 %v3231_v58  ;;  %2912 = vmatpush3.bf16.msra.mxu1 %v3230_v57  ;;  %v487_v57 = vcombine.high %v3761_v53, %v3761_v53  ;;  %v3285_v58 = vld [vmem:[%s4238_s1 + $0x200] sm:$0xff]  }
  0x2a   :  { %2913 = vmatprep.subr.bf16.mxu1 %v3232_v59  ;;  %v3286_v59 = vld [vmem:[%s4238_s1 + $0x280] sm:$0xff]  }
  0x2c   :  { %2892 = vmatpush3.bf16.msra.mxu0 %v3233_v60  ;;  %v518_v60 = vcombine.high %v508_v56, %v508_v56 }
  0x2d   :  { %2893 = vmatprep.subr.bf16.mxu0 %v3235_v62  ;;  %2914 = vmatpush3.bf16.msra.mxu1 %v3234_v61  ;;  %v494_v61 = vrot.slane %v478_v48, %v3569_v41  ;;  %v3287_v62 = vld [vmem:[%s4238_s1 + $0x378] sm:$0xff]   ;;  %v3332_v48 = vld [vmem:[%s4238_s1 + $0x460] sm:$0xff]  }
  0x2e   :  { %2915 = vmatprep.subr.bf16.mxu1 %v3236_v63  ;;  %v3288_v63 = vld [vmem:[%s4238_s1 + $0x3f8] sm:$0xff]  }
  0x30   :  { %2894 = vmatpush3.bf16.msra.mxu0 %v3237_v0  ;;  %v515_v0 = vrot.slane %v487_v57, %v3569_v41  ;;  %v3341_v57 = vld [vmem:[%s4238_s1 + $0x4d0] sm:$0xff]  }
  0x31   :  { %2895 = vmatprep.subr.bf16.mxu0 %v3239_v2  ;;  %2916 = vmatpush3.bf16.msra.mxu1 %v3238_v1  ;;  %v3289_v1 = vld [vmem:[%s4238_s1 + $0x338] sm:$0xff]  }
  0x32   :  { %2917 = vmatprep.subr.bf16.mxu1 %v3240_v3  ;;  %v3290_v2 = vld [vmem:[%s4238_s1 + $0x3b8] sm:$0xff]   ;;  %v516_v3 = vcombine.high %v494_v61, %v494_v61 }
  0x34   :  { %2896 = vmatpush3.bf16.msra.mxu0 %v3241_v4  ;;  %v3291_v4 = vld [vmem:[%s4238_s1 + $0x370] sm:$0xff]  }
  0x35   :  { %2897 = vmatprep.subr.bf16.mxu0 %v3243_v6  ;;  %2918 = vmatpush3.bf16.msra.mxu1 %v3242_v5  ;;  %v3292_v5 = vld [vmem:[%s4238_s1 + $0x3f0] sm:$0xff]   ;;  %v519_v6 = vcombine.high %v515_v0, %v515_v0 }
  0x36   :  { %2919 = vmatprep.subr.bf16.mxu1 %v3244_v7  ;;  %v3293_v7 = vld [vmem:[%s4238_s1 + $0x330] sm:$0xff]  }
  0x38   :  { %2898 = vmatpush3.bf16.msra.mxu0 %v3245_v8  ;;  %v3294_v8 = vld [vmem:[%s4238_s1 + $0x3b0] sm:$0xff]  }
  0x39   :  { %2899 = vmatprep.subr.bf16.mxu0 %v3247_v10  ;;  %2920 = vmatpush3.bf16.msra.mxu1 %v3246_v9  ;;  %v3295_v9 = vld [vmem:[%s4238_s1 + $0x368] sm:$0xff]  }
  0x3a   :  { %2921 = vmatprep.subr.bf16.mxu1 %v3248_v11  ;;  %v3296_v10 = vld [vmem:[%s4238_s1 + $0x3e8] sm:$0xff]  }
  0x3b   :  { %v3297_v11 = vld [vmem:[%s4238_s1 + $0x328] sm:$0xff]  }
  0x3c   :  { %2900 = vmatpush3.bf16.msra.mxu0 %v3249_v12  ;;  %v3298_v12 = vld [vmem:[%s4238_s1 + $0x3a8] sm:$0xff]  }
  0x3d   :  { %2901 = vmatprep.subr.bf16.mxu0 %v3251_v14  ;;  %2922 = vmatpush3.bf16.msra.mxu1 %v3250_v13  ;;  %v3299_v13 = vld [vmem:[%s4238_s1 + $0x360] sm:$0xff]  }
  0x3e   :  { %2923 = vmatprep.subr.bf16.mxu1 %v3252_v15  ;;  %v3300_v14 = vld [vmem:[%s4238_s1 + $0x3e0] sm:$0xff]  }
  0x3f   :  { %v3301_v15 = vld [vmem:[%s4238_s1 + $0x320] sm:$0xff]  }
  0x40   :  { %2902 = vmatpush3.bf16.msra.mxu0 %v3253_v16  ;;  %v3302_v16 = vld [vmem:[%s4238_s1 + $0x3a0] sm:$0xff]  }
  0x41   :  { %2931 = vmatprep.subr.bf16.mxu0 %v3255_v19  ;;  %2924 = vmatpush3.bf16.msra.mxu1 %v3254_v17  ;;  %v3303_v17 = vld [vmem:[%s4238_s1 + $0x358] sm:$0xff]  }
  0x42   :  { %2953 = vmatprep.subr.bf16.mxu1 %v3256_v20  ;;  %v3305_v19 = vld [vmem:[%s4238_s1 + $0x318] sm:$0xff]  }
  0x43   :  { %1858 = vmatmul.mubr.bf16.vlgmr.msra.gmra.mxu0 %v452_v18  ;;  %v3304_v18 = vld [vmem:[%s4238_s1 + $0x3d8] sm:$0xff]  }
  0x44   :  { %2932 = vmatpush3.bf16.msra.mxu0 %v3257_v21  ;;  %1898 = vmatmul.mubr.bf16.vlgmr.msra.gmra.mxu1 %v468_v23  ;;  %v3306_v20 = vld [vmem:[%s4238_s1 + $0x398] sm:$0xff]   ;;  %v3307_v21 = vld [vmem:[%s4238_s1 + $0x350] sm:$0xff]  }
  0x45   :  { %2933 = vmatprep.subr.bf16.mxu0 %v3259_v24  ;;  %2954 = vmatpush3.bf16.msra.mxu1 %v3258_v22  ;;  %v3308_v22 = vld [vmem:[%s4238_s1 + $0x3d0] sm:$0xff]  }
  0x46   :  { %2955 = vmatprep.subr.bf16.mxu1 %v3260_v25  ;;  %1937 = vmatprep.mubr.bf16.mxu0 %v508_v56  ;;  %v3309_v23 = vld [vmem:[%s4238_s1 + $0x310] sm:$0xff]   ;;  %v3311_v25 = vld [vmem:[%s4238_s1 + $0x348] sm:$0xff]  }
  0x47   :  { %1977 = vmatprep.mubr.bf16.mxu1 %v518_v60  ;;  %v3310_v24 = vld [vmem:[%s4238_s1 + $0x390] sm:$0xff]   ;;  %v3344_v60 = vld [vmem:[%s4238_s1 + $0x448] sm:$0xff]  }
  0x48   :  { %2934 = vmatpush3.bf16.msra.mxu0 %v3261_v26  ;;  %v3312_v26 = vld [vmem:[%s4238_s1 + $0x3c8] sm:$0xff]   ;;  %v3340_v56 = vld [vmem:[%s4238_s1 + $0x450] sm:$0xff]  }
  0x49   :  { %2935 = vmatprep.subr.bf16.mxu0 %v3263_v28  ;;  %2956 = vmatpush3.bf16.msra.mxu1 %v3262_v27  ;;  %v3313_v27 = vld [vmem:[%s4238_s1 + $0x308] sm:$0xff]  }
  0x4a   :  { %2957 = vmatprep.subr.bf16.mxu1 %v3264_v29  ;;  %v3314_v28 = vld [vmem:[%s4238_s1 + $0x388] sm:$0xff]   ;;  %v3315_v29 = vld [vmem:[%s4238_s1 + $0x340] sm:$0xff]  }
  0x4c   :  { %2936 = vmatpush3.bf16.msra.mxu0 %v3265_v30  ;;  %v3316_v30 = vld [vmem:[%s4238_s1 + $0x3c0] sm:$0xff]  }
  0x4d   :  { %2937 = vmatprep.subr.bf16.mxu0 %v3267_v32  ;;  %2958 = vmatpush3.bf16.msra.mxu1 %v3266_v31  ;;  %v3317_v31 = vld [vmem:[%s4238_s1 + $0x300] sm:$0xff]  }
  0x4e   :  { %2959 = vmatprep.subr.bf16.mxu1 %v3268_v33  ;;  %v3318_v32 = vld [vmem:[%s4238_s1 + $0x380] sm:$0xff]   ;;  %v501_v33 = vrot.slane %v3761_v53, %v3569_v41  ;;  %v3337_v53 = vld [vmem:[%s4238_s1 + $0x4d8] sm:$0xff]  }
  0x50   :  { %2938 = vmatpush3.bf16.msra.mxu0 %v3269_v34  ;;  %v3320_v34 = vld [vmem:[%s4238_s1 + $0x478] sm:$0xff]  }
  0x51   :  { %2939 = vmatprep.subr.bf16.mxu0 %v3271_v36  ;;  %2960 = vmatpush3.bf16.msra.mxu1 %v3270_v35  ;;  %v3321_v35 = vld [vmem:[%s4238_s1 + $0x4f8] sm:$0xff]  }
  0x52   :  { %2961 = vmatprep.subr.bf16.mxu1 %v3272_v37  ;;  %v3322_v36 = vld [vmem:[%s4238_s1 + $0x438] sm:$0xff]  }
  0x53   :  { %v3323_v37 = vld [vmem:[%s4238_s1 + $0x4b8] sm:$0xff]  }
  0x54   :  { %2940 = vmatpush3.bf16.msra.mxu0 %v3273_v38  ;;  %v517_v38 = vcombine.high %v501_v33, %v501_v33 }
  0x55   :  { %2941 = vmatprep.subr.bf16.mxu0 %v3275_v40  ;;  %2962 = vmatpush3.bf16.msra.mxu1 %v3274_v39  ;;  %v3324_v39 = vld [vmem:[%s4238_s1 + $0x470] sm:$0xff]  }
  0x56   :  { %2963 = vmatprep.subr.bf16.mxu1 %v3276_v42  ;;  %v3325_v40 = vld [vmem:[%s4238_s1 + $0x4f0] sm:$0xff]  }
  0x57   :  { %v3326_v42 = vld [vmem:[%s4238_s1 + $0x430] sm:$0xff]  }
  0x58   :  { %2942 = vmatpush3.bf16.msra.mxu0 %v3277_v43  ;;  %v3327_v43 = vld [vmem:[%s4238_s1 + $0x4b0] sm:$0xff]  }
  0x59   :  { %2943 = vmatprep.subr.bf16.mxu0 %v3279_v45  ;;  %2964 = vmatpush3.bf16.msra.mxu1 %v3278_v44  ;;  %v3328_v44 = vld [vmem:[%s4238_s1 + $0x468] sm:$0xff]  }
  0x5a   :  { %2965 = vmatprep.subr.bf16.mxu1 %v3280_v47  ;;  %v3329_v45 = vld [vmem:[%s4238_s1 + $0x4e8] sm:$0xff]  }
  0x5b   :  { %v3331_v47 = vld [vmem:[%s4238_s1 + $0x4a8] sm:$0xff]  }
  0x5c   :  { %2944 = vmatpush3.bf16.msra.mxu0 %v3281_v50  ;;  %v3334_v50 = vld [vmem:[%s4238_s1 + $0x420] sm:$0xff]  }
  0x5d   :  { %2945 = vmatprep.subr.bf16.mxu0 %v3283_v54  ;;  %2966 = vmatpush3.bf16.msra.mxu1 %v3282_v51  ;;  %v3335_v51 = vld [vmem:[%s4238_s1 + $0x4a0] sm:$0xff]   ;;  %v3338_v54 = vld [vmem:[%s4238_s1 + $0x418] sm:$0xff]  }
  0x5e   :  { %2967 = vmatprep.subr.bf16.mxu1 %v3284_v55  ;;  %v3339_v55 = vld [vmem:[%s4238_s1 + $0x498] sm:$0xff]  }
  0x60   :  { %2946 = vmatpush3.bf16.msra.mxu0 %v3285_v58  ;;  %v3342_v58 = vld [vmem:[%s4238_s1 + $0x410] sm:$0xff]  }
  0x61   :  { %2975 = vmatprep.subr.bf16.mxu0 %v3287_v62  ;;  %2968 = vmatpush3.bf16.msra.mxu1 %v3286_v59  ;;  %v3343_v59 = vld [vmem:[%s4238_s1 + $0x490] sm:$0xff]   ;;  %v3345_v62 = vld [vmem:[%s4238_s1 + $0x4c8] sm:$0xff]  }
  0x62   :  { %2997 = vmatprep.subr.bf16.mxu1 %v3288_v63 }
  0x63   :  { %1938 = vmatmul.mubr.bf16.vlgmr.msra.gmra.mxu0 %v494_v61  ;;  %v33_v61 = vld [vmem:[%s4237_s0 + $0x10] sm:$0xff] }
  0x64   :  { %2976 = vmatpush3.bf16.msra.mxu0 %v3289_v1  ;;  %2017 = vmatprep.mubr.bf16.mxu0 %v515_v0  ;;  %v527_v63 = vrot.slane %v33_v61, %v3569_v41  ;;  %v520_v0 = vcombine.high %v33_v61, %v33_v61  ;;  %v3346_v1 = vld [vmem:[%s4238_s1 + $0x408] sm:$0xff]  }
  0x65   :  { %1978 = vmatmul.mubr.bf16.vlgmr.msra.gmra.mxu1 %v516_v3  ;;  %2977 = vmatprep.subr.bf16.mxu0 %v3291_v4 }
  0x66   :  { %2998 = vmatpush3.bf16.msra.mxu1 %v3290_v2  ;;  %2057 = vmatprep.mubr.bf16.mxu1 %v519_v6  ;;  %v3347_v2 = vld [vmem:[%s4238_s1 + $0x488] sm:$0xff]   ;;  %v535_v3 = vcombine.high %v527_v63, %v527_v63  ;;  %v3967_v4 = vrot.slane %v520_v0, %v3569_v41  ;;  %v3349_v6 = vld [vmem:[%s4238_s1 + $0x4c0] sm:$0xff]  }
  0x67   :  { %2999 = vmatprep.subr.bf16.mxu1 %v3292_v5  ;;  %v3348_v5 = vld [vmem:[%s4238_s1 + $0x440] sm:$0xff]  }
  0x68   :  { %2978 = vmatpush3.bf16.msra.mxu0 %v3293_v7  ;;  %v557_v7 = vrot.slane %v535_v3, %v3569_v41 }
  0x69   :  { %2979 = vmatprep.subr.bf16.mxu0 %v3295_v9  ;;  %v3350_v9 = vld [vmem:[%s4238_s1 + $0x400] sm:$0xff]  }
  0x6a   :  { %3000 = vmatpush3.bf16.msra.mxu1 %v3294_v8  ;;  %v536_v8 = vcombine.high %v3967_v4, %v3967_v4 }
  0x6b   :  { %3001 = vmatprep.subr.bf16.mxu1 %v3296_v10  ;;  %v3351_v10 = vld [vmem:[%s4238_s1 + $0x480] sm:$0xff]  }
  0x6c   :  { %2980 = vmatpush3.bf16.msra.mxu0 %v3297_v11  ;;  %v567_v11 = vcombine.high %v557_v7, %v557_v7 }
  0x6d   :  { %2981 = vmatprep.subr.bf16.mxu0 %v3299_v13  ;;  %v3352_v13 = vld [vmem:[%s4238_s1 + $0x578] sm:$0xff]  }
  0x6e   :  { %3002 = vmatpush3.bf16.msra.mxu1 %v3298_v12  ;;  %v543_v12 = vrot.slane %v527_v63, %v3569_v41 }
  0x6f   :  { %3003 = vmatprep.subr.bf16.mxu1 %v3300_v14  ;;  %v3353_v14 = vld [vmem:[%s4238_s1 + $0x5f8] sm:$0xff]  }
  0x70   :  { %2982 = vmatpush3.bf16.msra.mxu0 %v3301_v15  ;;  %v564_v15 = vrot.slane %v536_v8, %v3569_v41 }
  0x71   :  { %2983 = vmatprep.subr.bf16.mxu0 %v3303_v17  ;;  %v3355_v17 = vld [vmem:[%s4238_s1 + $0x5b8] sm:$0xff]  }
  0x72   :  { %3004 = vmatpush3.bf16.msra.mxu1 %v3302_v16  ;;  %v3354_v16 = vld [vmem:[%s4238_s1 + $0x538] sm:$0xff]  }
  0x73   :  { %3005 = vmatprep.subr.bf16.mxu1 %v3304_v18  ;;  %v565_v18 = vcombine.high %v543_v12, %v543_v12 }
  0x74   :  { %2984 = vmatpush3.bf16.msra.mxu0 %v3305_v19  ;;  %v3356_v19 = vld [vmem:[%s4238_s1 + $0x570] sm:$0xff]  }
  0x75   :  { %2985 = vmatprep.subr.bf16.mxu0 %v3307_v21  ;;  %v568_v21 = vcombine.high %v564_v15, %v564_v15 }
  0x76   :  { %3006 = vmatpush3.bf16.msra.mxu1 %v3306_v20  ;;  %v3357_v20 = vld [vmem:[%s4238_s1 + $0x5f0] sm:$0xff]  }
  0x77   :  { %3007 = vmatprep.subr.bf16.mxu1 %v3308_v22  ;;  %v3358_v22 = vld [vmem:[%s4238_s1 + $0x530] sm:$0xff]  }
  0x78   :  { %2986 = vmatpush3.bf16.msra.mxu0 %v3309_v23  ;;  %v3359_v23 = vld [vmem:[%s4238_s1 + $0x5b0] sm:$0xff]  }
  0x79   :  { %2987 = vmatprep.subr.bf16.mxu0 %v3311_v25  ;;  %v3361_v25 = vld [vmem:[%s4238_s1 + $0x5e8] sm:$0xff]  }
  0x7a   :  { %3008 = vmatpush3.bf16.msra.mxu1 %v3310_v24  ;;  %v3360_v24 = vld [vmem:[%s4238_s1 + $0x568] sm:$0xff]  }
  0x7b   :  { %3009 = vmatprep.subr.bf16.mxu1 %v3312_v26  ;;  %v3362_v26 = vld [vmem:[%s4238_s1 + $0x528] sm:$0xff]  }
  0x7c   :  { %2988 = vmatpush3.bf16.msra.mxu0 %v3313_v27  ;;  %v3363_v27 = vld [vmem:[%s4238_s1 + $0x5a8] sm:$0xff]  }
  0x7d   :  { %2989 = vmatprep.subr.bf16.mxu0 %v3315_v29  ;;  %v3365_v29 = vld [vmem:[%s4238_s1 + $0x5e0] sm:$0xff]  }
  0x7e   :  { %3010 = vmatpush3.bf16.msra.mxu1 %v3314_v28  ;;  %v3364_v28 = vld [vmem:[%s4238_s1 + $0x560] sm:$0xff]  }
  0x7f   :  { %3011 = vmatprep.subr.bf16.mxu1 %v3316_v30  ;;  %v3366_v30 = vld [vmem:[%s4238_s1 + $0x520] sm:$0xff]  }
  0x80   :  { %2990 = vmatpush3.bf16.msra.mxu0 %v3317_v31  ;;  %v3367_v31 = vld [vmem:[%s4238_s1 + $0x5a0] sm:$0xff]  }
  0x81   :  { %3019 = vmatprep.subr.bf16.mxu0 %v3320_v34  ;;  %v3370_v34 = vld [vmem:[%s4238_s1 + $0x518] sm:$0xff]  }
  0x82   :  { %3012 = vmatpush3.bf16.msra.mxu1 %v3318_v32  ;;  %v3368_v32 = vld [vmem:[%s4238_s1 + $0x558] sm:$0xff]  }
  0x83   :  { %2018 = vmatmul.mubr.bf16.vlgmr.msra.gmra.mxu0 %v501_v33  ;;  %3041 = vmatprep.subr.bf16.mxu1 %v3321_v35  ;;  %v3369_v33 = vld [vmem:[%s4238_s1 + $0x5d8] sm:$0xff]  }
  0x84   :  { %3020 = vmatpush3.bf16.msra.mxu0 %v3322_v36  ;;  %2097 = vmatprep.mubr.bf16.mxu0 %v557_v7  ;;  %v3371_v35 = vld [vmem:[%s4238_s1 + $0x598] sm:$0xff]   ;;  %v3372_v36 = vld [vmem:[%s4238_s1 + $0x550] sm:$0xff]  }
  0x85   :  { %2058 = vmatmul.mubr.bf16.vlgmr.msra.gmra.mxu1 %v517_v38  ;;  %3021 = vmatprep.subr.bf16.mxu0 %v3324_v39  ;;  %v3374_v38 = vld [vmem:[%s4238_s1 + $0x510] sm:$0xff]  }
  0x86   :  { %3042 = vmatpush3.bf16.msra.mxu1 %v3323_v37  ;;  %2137 = vmatprep.mubr.bf16.mxu1 %v567_v11  ;;  %v3373_v37 = vld [vmem:[%s4238_s1 + $0x5d0] sm:$0xff]  }
  0x87   :  { %3043 = vmatprep.subr.bf16.mxu1 %v3325_v40  ;;  %v3375_v39 = vld [vmem:[%s4238_s1 + $0x590] sm:$0xff]   ;;  %v3376_v40 = vld [vmem:[%s4238_s1 + $0x548] sm:$0xff]  }
  0x88   :  { %3022 = vmatpush3.bf16.msra.mxu0 %v3326_v42  ;;  %v3377_v42 = vld [vmem:[%s4238_s1 + $0x5c8] sm:$0xff]  }
  0x89   :  { %3023 = vmatprep.subr.bf16.mxu0 %v3328_v44  ;;  %v3380_v44 = vld [vmem:[%s4238_s1 + $0x540] sm:$0xff]  }
  0x8a   :  { %3044 = vmatpush3.bf16.msra.mxu1 %v3327_v43  ;;  %v3378_v43 = vld [vmem:[%s4238_s1 + $0x508] sm:$0xff]  }
  0x8b   :  { %3045 = vmatprep.subr.bf16.mxu1 %v3329_v45  ;;  %v3379_v45 = vld [vmem:[%s4238_s1 + $0x588] sm:$0xff]  }
  0x8c   :  { %3024 = vmatpush3.bf16.msra.mxu0 %v3330_v46  ;;  %v3381_v46 = vld [vmem:[%s4238_s1 + $0x5c0] sm:$0xff]  }
  0x8d   :  { %3025 = vmatprep.subr.bf16.mxu0 %v3332_v48  ;;  %v3383_v48 = vld [vmem:[%s4238_s1 + $0x580] sm:$0xff]  }
  0x8e   :  { %3046 = vmatpush3.bf16.msra.mxu1 %v3331_v47  ;;  %v3382_v47 = vld [vmem:[%s4238_s1 + $0x500] sm:$0xff]  }
  0x8f   :  { %3047 = vmatprep.subr.bf16.mxu1 %v3333_v49  ;;  %v550_v49 = vrot.slane %v3967_v4, %v3569_v41 }
  0x90   :  { %3026 = vmatpush3.bf16.msra.mxu0 %v3334_v50 }
  0x91   :  { %3027 = vmatprep.subr.bf16.mxu0 %v3336_v52  ;;  %v566_v50 = vcombine.high %v550_v49, %v550_v49 }
  0x92   :  { %3048 = vmatpush3.bf16.msra.mxu1 %v3335_v51 }
  0x93   :  { %3049 = vmatprep.subr.bf16.mxu1 %v3337_v53 }
  0x94   :  { %3028 = vmatpush3.bf16.msra.mxu0 %v3338_v54 }
  0x95   :  { %3029 = vmatprep.subr.bf16.mxu0 %v3340_v56 }
  0x96   :  { %3050 = vmatpush3.bf16.msra.mxu1 %v3339_v55 }
  0x97   :  { %3051 = vmatprep.subr.bf16.mxu1 %v3341_v57 }
  0x98   :  { %3030 = vmatpush3.bf16.msra.mxu0 %v3342_v58 }
  0x99   :  { %3031 = vmatprep.subr.bf16.mxu0 %v3344_v60 }
  0x9a   :  { %3052 = vmatpush3.bf16.msra.mxu1 %v3343_v59 }
  0x9b   :  { %3053 = vmatprep.subr.bf16.mxu1 %v3345_v62 }
  0x9c   :  { %3032 = vmatpush3.bf16.msra.mxu0 %v3346_v1 }
  0x9d   :  { %3033 = vmatprep.subr.bf16.mxu0 %v3348_v5 }
  0x9e   :  { %3054 = vmatpush3.bf16.msra.mxu1 %v3347_v2 }
  0x9f   :  { %3055 = vmatprep.subr.bf16.mxu1 %v3349_v6 }
  0xa0   :  { %3034 = vmatpush3.bf16.msra.mxu0 %v3350_v9 }
  0xa1   :  { %3063 = vmatprep.subr.bf16.mxu0 %v3352_v13 }
  0xa2   :  { %3056 = vmatpush3.bf16.msra.mxu1 %v3351_v10 }
  0xa3   :  { %2098 = vmatmul.mubr.bf16.vlgmr.msra.gmra.mxu0 %v543_v12  ;;  %3085 = vmatprep.subr.bf16.mxu1 %v3353_v14 }
  0xa4   :  { %3064 = vmatpush3.bf16.msra.mxu0 %v3354_v16  ;;  %2177 = vmatprep.mubr.bf16.mxu0 %v564_v15 }
  0xa5   :  { %2138 = vmatmul.mubr.bf16.vlgmr.msra.gmra.mxu1 %v565_v18  ;;  %3065 = vmatprep.subr.bf16.mxu0 %v3356_v19 }
  0xa6   :  { %3086 = vmatpush3.bf16.msra.mxu1 %v3355_v17  ;;  %2217 = vmatprep.mubr.bf16.mxu1 %v568_v21 }
  0xa7   :  { %3087 = vmatprep.subr.bf16.mxu1 %v3357_v20 }
  0xa8   :  { %3066 = vmatpush3.bf16.msra.mxu0 %v3358_v22 }
  0xa9   :  { %3067 = vmatprep.subr.bf16.mxu0 %v3360_v24 }
  0xaa   :  { %3088 = vmatpush3.bf16.msra.mxu1 %v3359_v23 }
  0xab   :  { %3089 = vmatprep.subr.bf16.mxu1 %v3361_v25 }
  0xac   :  { %3068 = vmatpush3.bf16.msra.mxu0 %v3362_v26 }
  0xad   :  { %3069 = vmatprep.subr.bf16.mxu0 %v3364_v28 }
  0xae   :  { %3090 = vmatpush3.bf16.msra.mxu1 %v3363_v27 }
  0xaf   :  { %3091 = vmatprep.subr.bf16.mxu1 %v3365_v29 }
  0xb0   :  { %3070 = vmatpush3.bf16.msra.mxu0 %v3366_v30 }
  0xb1   :  { %3071 = vmatprep.subr.bf16.mxu0 %v3368_v32 }
  0xb2   :  { %3092 = vmatpush3.bf16.msra.mxu1 %v3367_v31 }
  0xb3   :  { %3093 = vmatprep.subr.bf16.mxu1 %v3369_v33 }
  0xb4   :  { %3072 = vmatpush3.bf16.msra.mxu0 %v3370_v34 }
  0xb5   :  { %3073 = vmatprep.subr.bf16.mxu0 %v3372_v36 }
  0xb6   :  { %3094 = vmatpush3.bf16.msra.mxu1 %v3371_v35 }
  0xb7   :  { %3095 = vmatprep.subr.bf16.mxu1 %v3373_v37 }
  0xb8   :  { %3074 = vmatpush3.bf16.msra.mxu0 %v3374_v38 }
  0xb9   :  { %3075 = vmatprep.subr.bf16.mxu0 %v3376_v40 }
  0xba   :  { %3096 = vmatpush3.bf16.msra.mxu1 %v3375_v39 }
  0xbb   :  { %3097 = vmatprep.subr.bf16.mxu1 %v3377_v42 }
  0xbc   :  { %3076 = vmatpush3.bf16.msra.mxu0 %v3378_v43 }
  0xbd   :  { %3077 = vmatprep.subr.bf16.mxu0 %v3380_v44 }
  0xbe   :  { %3098 = vmatpush3.bf16.msra.mxu1 %v3379_v45 }
  0xbf   :  { %3099 = vmatprep.subr.bf16.mxu1 %v3381_v46 }
  0xc0   :  { %3078 = vmatpush3.bf16.msra.mxu0 %v3382_v47 }
  0xc2   :  { %3100 = vmatpush3.bf16.msra.mxu1 %v3383_v48 }
  0xc3   :  { %2178 = vmatmul.mubr.bf16.vlgmr.msra.gmra.mxu0 %v550_v49 }
  0xc4   :  { %10 = vsyncpa [#allocation3], 0  ;;  %v4087_v41 = vld [vmem:[%s4240_s3 + $0x78] sm:$0xff]   ;;  %v4099_v2 = vld [vmem:[%s4240_s3 + $0x70] sm:$0xff]   ;;  %v3430_v4 = vmov 0.0   ;;  %vm3431_vm0 = vmmov 0  }
  0xc5   :  { %2218 = vmatmul.mubr.bf16.vlgmr.msra.gmra.mxu1 %v566_v50  ;;  %v4092_v62 = vld [vmem:[%s4240_s3 + $0x38] sm:$0xff]   ;;  %3107 = vmatprep.subr.bf16.mxu0 %v4087_v41  ;;  %26 = vst [vmem:[#allocation2] sm:$0x3] %v3430_v4  ;;  %v4105_v5 = vld [vmem:[%s4240_s3 + $0x30] sm:$0xff]   ;;  %v4113_v12 = vld [vmem:[%s4240_s3 + $0x68] sm:$0xff]   ;;  %vm2427_vm1 = vcmask 261120  }
  0xc6   :  { %3108 = vmatpush3.bf16.msra.mxu0 %v4092_v62  ;;  %3161 = vmatprep.subr.bf16.mxu1 %v3430_v4  ;;  %v4118_v14 = vld [vmem:[%s4240_s3 + $0x28] sm:$0xff]   ;;  %v4125_v16 = vld [vmem:[%s4240_s3 + $0x60] sm:$0xff]   ;;  %v4135_v18 = vld [vmem:[%s4240_s3 + $0x58] sm:$0xff]   ;;  %vm2455_vm2 = vcmask 523264   ;;  %s3433_s21 = smov [#allocation2]  }
  0xc7   :  { %3109 = vmatprep.subr.bf16.mxu0 %v4099_v2  ;;  %v4130_v17 = vld [vmem:[%s4240_s3 + $0x20] sm:$0xff]   ;;  %v4142_v19 = vld [vmem:[%s4240_s3 + $0x18] sm:$0xff]   ;;  %v4148_v20 = vld [vmem:[%s4240_s3 + $0x50] sm:$0xff]   ;;  %3169 = vmatprep.mubr.msk.bf16.mxu1 %vm3431_vm0, %v3430_v4  ;;  %s2617_s22 = sshll.u32 %s3433_s21, 4  ;;  %s2618_s22 = int_to_ptr.vmem [resolvable:$true] %s2617_s22 }
  0xc8   :  { %v4154_v21 = vld [vmem:[%s4240_s3 + $0x10] sm:$0xff]   ;;  %v4160_v22 = vld [vmem:[%s4240_s3 + $0x48] sm:$0xff]   ;;  %v4172_v24 = vld [vmem:[%s4240_s3 + $0x40] sm:$0xff]   ;;  %s3407_s23 = scalar_lea.vmem %s2618_s22, 32  ;;  %p3412_p1 = scmp.lt.s32.totalorder %s2618_s22, %s2618_s22 }
  0xc9   :  { %v4166_v23 = vld [vmem:[%s4240_s3 + $0x8] sm:$0xff]   ;;  %v4178_v25 = vld [vmem:[%s4240_s3] sm:$0xff]   ;;  %p3408_p0 = scmp.ne.s32.totalorder %s2618_s22, %s3407_s23  ;;  %p3413_p2 = scmp.lt.s32.totalorder %s3407_s23, %s3407_s23 }
  0xca   :  { %3110 = vmatpush3.bf16.msra.mxu0 %v4105_v5 }
  0xcb   :  { %3111 = vmatprep.subr.bf16.mxu0 %v4113_v12  ;;  %p3414_p3 = por %p3413_p2, %p3412_p1 }
  0xcd   :  { %p3415_p4 = pnand %p3414_p3, %p3408_p0 }
  0xce   :  { %3112 = vmatpush3.bf16.msra.mxu0 %v4118_v14 }
  0xcf   :  { %3113 = vmatprep.subr.bf16.mxu0 %v4125_v16 }
  0xd2   :  { %3114 = vmatpush3.bf16.msra.mxu0 %v4130_v17 }
  0xd3   :  { %3115 = vmatprep.subr.bf16.mxu0 %v4135_v18 }
  0xd6   :  { %3116 = vmatpush3.bf16.msra.mxu0 %v4142_v19 }
  0xd7   :  { %3117 = vmatprep.subr.bf16.mxu0 %v4148_v20 }
  0xda   :  { %3118 = vmatpush3.bf16.msra.mxu0 %v4154_v21 }
  0xdb   :  { %3119 = vmatprep.subr.bf16.mxu0 %v4160_v22 }
  0xde   :  { %3120 = vmatpush3.bf16.msra.mxu0 %v4166_v23 }
  0xdf   :  { %3121 = vmatprep.subr.bf16.mxu0 %v4172_v24 }
  0xe2   :  { %3122 = vmatpush3.bf16.msra.mxu0 %v4178_v25 }
  0xe3   :  { %v2859_v51 = vpop.f32.mrf.mxu0  ;;  %3173 = vmatprep.subr.bf16.mxu0 %v3430_v4 }
  0xe4   :  { %v2881_v52 = vpop.f32.mrf.mxu1 }
  0xe5   :  { %v2860_v53 = vpop.f32.mrf.mxu0 }
  0xe6   :  { %v2861_v54 = vadd.f32 %v2860_v53, %v2859_v51  ;;  %v2882_v55 = vpop.f32.mrf.mxu1 }
  0xe7   :  { %v2862_v56 = vpop.f32.mrf.mxu0  ;;  %v2883_v57 = vadd.f32 %v2882_v55, %v2881_v52 }
  0xe8   :  { %v2884_v58 = vpop.f32.mrf.mxu1 }
  0xe9   :  { %v2863_v59 = vpop.f32.mrf.mxu0  ;;  %v1820_v60 = vadd.f32 %v2883_v57, %v2861_v54 }
  0xea   :  { %v2885_v61 = vpop.f32.mrf.mxu1 }
 0x103   :  { %v2903_v63 = vpop.f32.mrf.mxu0 }
 0x104   :  { %v2925_v0 = vpop.f32.mrf.mxu1 }
 0x105   :  { %v2904_v1 = vpop.f32.mrf.mxu0 }
 0x106   :  { %v2905_v3 = vadd.f32 %v2904_v1, %v2903_v63  ;;  %v2926_v6 = vpop.f32.mrf.mxu1 }
 0x107   :  { %v2906_v7 = vpop.f32.mrf.mxu0  ;;  %v2927_v9 = vadd.f32 %v2926_v6, %v2925_v0 }
 0x108   :  { %v1860_v8 = vadd.f32 %v2905_v3, %v1820_v60  ;;  %v2928_v10 = vpop.f32.mrf.mxu1 }
 0x109   :  { %v2907_v11 = vpop.f32.mrf.mxu0 }
 0x10a   :  { %v1900_v13 = vadd.f32 %v2927_v9, %v1860_v8  ;;  %v2929_v15 = vpop.f32.mrf.mxu1  ;;  %v34_v11 = vld [vmem:[#allocation2] sm:$0x3] }
 0x123   :  { %v2947_v26 = vpop.f32.mrf.mxu0 }
 0x125   :  { %v2969_v27 = vpop.f32.mrf.mxu1  ;;  %v2948_v28 = vpop.f32.mrf.mxu0 }
 0x126   :  { %v2949_v29 = vadd.f32 %v2948_v28, %v2947_v26 }
 0x127   :  { %v2970_v30 = vpop.f32.mrf.mxu1  ;;  %v2950_v31 = vpop.f32.mrf.mxu0 }
 0x128   :  { %v1940_v32 = vadd.f32 %v2949_v29, %v1900_v13  ;;  %v2971_v33 = vadd.f32 %v2970_v30, %v2969_v27  ;;  %v2818_v29 = vld [vmem:[%s4239_s2] ss:$0 sm:$0xff] }
 0x129   :  { %v2972_v34 = vpop.f32.mrf.mxu1  ;;  %v2951_v35 = vpop.f32.mrf.mxu0 }
 0x12a   :  { %v1980_v36 = vadd.f32 %v2971_v33, %v1940_v32 }
 0x12b   :  { %v2973_v37 = vpop.f32.mrf.mxu1 }
 0x12c   :  { %v3402_v37 = vld [vmem:[%s4241_s4 + $0x10] sm:$0xff]  }
 0x143   :  { %v2991_v38 = vpop.f32.mrf.mxu0 }
 0x145   :  { %v3013_v39 = vpop.f32.mrf.mxu1  ;;  %v2992_v40 = vpop.f32.mrf.mxu0 }
 0x146   :  { %v2993_v55 = vadd.f32 %v2992_v40, %v2991_v38  ;;  %v3403_v38 = vld [vmem:[%s4241_s4 + $0x8] sm:$0xff]  }
 0x147   :  { %v3014_v42 = vpop.f32.mrf.mxu1  ;;  %v2994_v43 = vpop.f32.mrf.mxu0 }
 0x148   :  { %v2020_v56 = vadd.f32 %v2993_v55, %v1980_v36  ;;  %v3015_v57 = vadd.f32 %v3014_v42, %v3013_v39  ;;  %v3401_v36 = vld [vmem:[%s4241_s4 + $0x18] sm:$0xff]   ;;  %v3404_v39 = vld [vmem:[%s4241_s4] sm:$0xff]   ;;  %s3432_s4 = smov 32  }
 0x149   :  { %v3016_v44 = vpop.f32.mrf.mxu1  ;;  %v2995_v45 = vpop.f32.mrf.mxu0  ;;  %3162 = vmatpush3.bf16.msra.mxu1 %v3401_v36 }
 0x14a   :  { %v2060_v59 = vadd.f32 %v3015_v57, %v2020_v56  ;;  %3163 = vmatprep.subr.bf16.mxu1 %v3430_v4 }
 0x14b   :  { %v3017_v46 = vpop.f32.mrf.mxu1 }
 0x14d   :  { %3164 = vmatpush3.bf16.msra.mxu1 %v3402_v37 }
 0x14e   :  { %3165 = vmatprep.subr.bf16.mxu1 %v3430_v4 }
 0x151   :  { %3166 = vmatpush3.bf16.msra.mxu1 %v3403_v38 }
 0x152   :  { %3167 = vmatprep.subr.bf16.mxu1 %v3430_v4 }
 0x155   :  { %3168 = vmatpush3.bf16.msra.mxu1 %v3404_v39 }
 0x156   :  { %3134 = vmatprep.subr.bf16.mxu1 %v4087_v41 }
 0x163   :  { %v3035_v47 = vpop.f32.mrf.mxu0 }
 0x165   :  { %v3057_v48 = vpop.f32.mrf.mxu1  ;;  %v3036_v49 = vpop.f32.mrf.mxu0 }
 0x166   :  { %v3037_v58 = vadd.f32 %v3036_v49, %v3035_v47 }
 0x167   :  { %v3058_v50 = vpop.f32.mrf.mxu1  ;;  %v3038_v51 = vpop.f32.mrf.mxu0 }
 0x168   :  { %v2100_v60 = vadd.f32 %v3037_v58, %v2060_v59  ;;  %v3059_v61 = vadd.f32 %v3058_v50, %v3057_v48 }
 0x169   :  { %v3060_v52 = vpop.f32.mrf.mxu1  ;;  %v3039_v53 = vpop.f32.mrf.mxu0 }
 0x16a   :  { %v2140_v3 = vadd.f32 %v3059_v61, %v2100_v60  ;;  %v2841_v60 = vld [vmem:[%s4239_s2 + $0x1] ss:$0 sm:$0xff] }
 0x16b   :  { %v3061_v54 = vpop.f32.mrf.mxu1 }
 0x183   :  { %v3079_v63 = vpop.f32.mrf.mxu0 }
 0x185   :  { %v3101_v0 = vpop.f32.mrf.mxu1  ;;  %v3080_v1 = vpop.f32.mrf.mxu0 }
 0x186   :  { %v3081_v6 = vadd.f32 %v3080_v1, %v3079_v63 }
 0x187   :  { %v3102_v7 = vpop.f32.mrf.mxu1  ;;  %v3082_v8 = vpop.f32.mrf.mxu0 }
 0x188   :  { %v2180_v9 = vadd.f32 %v3081_v6, %v2140_v3  ;;  %v3103_v10 = vadd.f32 %v3102_v7, %v3101_v0  ;;  %v2842_v0 = vld [vmem:[%s4239_s2 + $0x2] ss:$0 sm:$0xff] }
 0x189   :  { %v3104_v13 = vpop.f32.mrf.mxu1  ;;  %v3083_v15 = vpop.f32.mrf.mxu0 }
 0x18a   :  { %v2220_v26 = vadd.f32 %v3103_v10, %v2180_v9 }
 0x18b   :  { %v3105_v27 = vpop.f32.mrf.mxu1 }
 0x18c   :  { %v2225_v28 = vadd.f32 %v2220_v26, %v34_v11 }
 0x18e   :  { %2226 = vst [vmem:[#allocation2] sm:$0x3] %v2225_v28 }
 0x195   :  { %v2233_v30 = vld [vmem:[#allocation2] sm:$0x3] }
 0x196   :  { %v2238_v31 = vadd.f32 %v2818_v29, %v2233_v30 }
 0x198   :  { %v2279_v32 = vpack.c.bf16 %v2238_v31, %v2238_v31 }
 0x19a   :  { %v2280_v33 = vunpack.c.l.bf16 %v2279_v32 }
 0x19c   :  { %v2281_v34 = vsub.f32 %v2238_v31, %v2280_v33 }
 0x19e   :  { %v2282_v35 = vpack.c.bf16 %v2281_v34, %v2281_v34 }
 0x1a0   :  { %2411 = vmatprep.mubr.bf16.mxu0 %v2282_v35 }
 0x1a1   :  { %2412 = vmatmul.mubr.bf16.vlgmr.msra.gmra.mxu0 %v2279_v32 }
 0x1a2   :  { %3174 = vmatpush3.bf16.msra.mxu0 %v3401_v36  ;;  %3181 = vmatprep.mubr.msk.bf16.mxu0 %vm3431_vm0, %v3430_v4 }
 0x1a3   :  { %3175 = vmatprep.subr.bf16.mxu0 %v3430_v4 }
 0x1a6   :  { %3176 = vmatpush3.bf16.msra.mxu0 %v3402_v37 }
 0x1a7   :  { %3177 = vmatprep.subr.bf16.mxu0 %v3430_v4 }
 0x1aa   :  { %3178 = vmatpush3.bf16.msra.mxu0 %v3403_v38 }
 0x1ab   :  { %3179 = vmatprep.subr.bf16.mxu0 %v3430_v4 }
 0x1ae   :  { %3180 = vmatpush3.bf16.msra.mxu0 %v3404_v39 }
 0x261   :  { %v3123_v40 = vpop.f32.mrf.mxu0 }
 0x263   :  { %v3124_v42 = vpop.f32.mrf.mxu0 }
 0x264   :  { %v3125_v43 = vadd.f32 %v3124_v42, %v3123_v40 }
 0x265   :  { %v3126_v44 = vpop.f32.mrf.mxu0 }
 0x266   :  { %v2419_v45 = vmul.f32 0.25, %v3125_v43 }
 0x267   :  { %v3127_v46 = vpop.f32.mrf.mxu0 }
 0x268   :  { %v2420_v47 = vpack.c.bf16 %v2419_v45, %v2419_v45 }
 0x26a   :  { %v2421_v48 = vunpack.c.l.bf16 %v2420_v47 }
 0x26c   :  { %v2422_v49 = vsub.f32 %v2419_v45, %v2421_v48 }
 0x26e   :  { %v2423_v50 = vpack.c.bf16 %v2422_v49, %v2422_v49 }
 0x270   :  { %2425 = vrot.lane.b32.xlu0 %v2423_v50, %s3432_s4 }
 0x2e2   :  { %v2426_v41 = vpop.permute.xlu0 %2425 }
 0x2e3   :  { %v2430_v51 = vsel %vm2427_vm1, %v2420_v47, %v2426_v41 }
 0x2e4   :  { %3170 = vmatmul.mubr.msk.bf16.vlgmr.msra.gmra.mxu1 %vm2455_vm2, %v2430_v51 }
 0x2e5   :  { %3135 = vmatpush3.bf16.msra.mxu1 %v4092_v62 }
 0x2e6   :  { %3136 = vmatprep.subr.bf16.mxu1 %v4099_v2 }
 0x2e9   :  { %3137 = vmatpush3.bf16.msra.mxu1 %v4105_v5 }
 0x2ea   :  { %3138 = vmatprep.subr.bf16.mxu1 %v4113_v12 }
 0x2ed   :  { %3139 = vmatpush3.bf16.msra.mxu1 %v4118_v14 }
 0x2ee   :  { %3140 = vmatprep.subr.bf16.mxu1 %v4125_v16 }
 0x2f1   :  { %3141 = vmatpush3.bf16.msra.mxu1 %v4130_v17 }
 0x2f2   :  { %3142 = vmatprep.subr.bf16.mxu1 %v4135_v18 }
 0x2f5   :  { %3143 = vmatpush3.bf16.msra.mxu1 %v4142_v19 }
 0x2f6   :  { %3144 = vmatprep.subr.bf16.mxu1 %v4148_v20 }
 0x2f9   :  { %3145 = vmatpush3.bf16.msra.mxu1 %v4154_v21 }
 0x2fa   :  { %3146 = vmatprep.subr.bf16.mxu1 %v4160_v22 }
 0x2fd   :  { %3147 = vmatpush3.bf16.msra.mxu1 %v4166_v23 }
 0x2fe   :  { %3148 = vmatprep.subr.bf16.mxu1 %v4172_v24 }
 0x301   :  { %3149 = vmatpush3.bf16.msra.mxu1 %v4178_v25 }
 0x3a4   :  { %v2492_v62 = vpop.f32.mrf.mxu1 }
 0x3a5   :  { %v2498_v2 = vsub.f32 %v2238_v31, %v2492_v62 }
 0x3a6   :  { %v3171_v4 = vpop.f32.mrf.mxu1 }
 0x3a7   :  { %v2499_v5 = vmul.f32 %v2498_v2, %v2498_v2 }
 0x3a8   :  { %v2495_v12 = vpop.f32.mrf.mxu1 }
 0x3a9   :  { %v2500_v14 = vpack.c.bf16 %v2499_v5, %v2499_v5 }
 0x3aa   :  { %v3172_v16 = vpop.f32.mrf.mxu1 }
 0x3ab   :  { %v2501_v17 = vunpack.c.l.bf16 %v2500_v14 }
 0x3ad   :  { %v2502_v18 = vsub.f32 %v2499_v5, %v2501_v17 }
 0x3af   :  { %v2503_v19 = vpack.c.bf16 %v2502_v18, %v2502_v18 }
 0x3b1   :  { %2536 = vmatprep.mubr.bf16.mxu1 %v2503_v19 }
 0x3b2   :  { %2537 = vmatmul.mubr.bf16.vlgmr.msra.gmra.mxu1 %v2500_v14 }
 0x472   :  { %v3150_v20 = vpop.f32.mrf.mxu1 }
 0x474   :  { %v3151_v21 = vpop.f32.mrf.mxu1 }
 0x475   :  { %v3152_v22 = vadd.f32 %v3151_v21, %v3150_v20 }
 0x476   :  { %v3153_v23 = vpop.f32.mrf.mxu1 }
 0x477   :  { %v2544_v52 = vmul.f32 0.25, %v3152_v22 }
 0x478   :  { %v3154_v24 = vpop.f32.mrf.mxu1 }
 0x479   :  { %v2545_v53 = vadd.f32 1e-05, %v2544_v52 }
 0x47b   :  { %3405 = vrsqrt.f32 %v2545_v53 }
 0x488   :  { %v3406_v25 = vpop.eup %3405 }
 0x489   :  { %v2547_v54 = vpack.c.bf16 %v3406_v25, %v3406_v25 }
 0x48b   :  { %v2548_v55 = vunpack.c.l.bf16 %v2547_v54 }
 0x48d   :  { %v2549_v56 = vsub.f32 %v3406_v25, %v2548_v55 }
 0x48f   :  { %v2550_v57 = vpack.c.bf16 %v2549_v56, %v2549_v56 }
 0x491   :  { %2552 = vrot.lane.b32.xlu0 %v2550_v57, %s3432_s4 }
 0x503   :  { %v2553_v58 = vpop.permute.xlu0 %2552 }
 0x504   :  { %v2556_v59 = vsel %vm2427_vm1, %v2547_v54, %v2553_v58 }
 0x505   :  { %3182 = vmatmul.mubr.msk.bf16.vlgmr.msra.gmra.mxu0 %vm2455_vm2, %v2556_v59 }
 0x5c5   :  { %v2593_v61 = vpop.f32.mrf.mxu0 }
 0x5c6   :  { %v2603_v63 = vmul.f32 %v2841_v60, %v2593_v61 }
 0x5c7   :  { %v3183_v1 = vpop.f32.mrf.mxu0 }
 0x5c8   :  { %v2604_v3 = vmul.f32 %v2603_v63, %v2498_v2 }
 0x5c9   :  { %v2596_v6 = vpop.f32.mrf.mxu0 }
 0x5ca   :  { %v2609_v7 = vadd.f32 %v2842_v0, %v2604_v3 }
 0x5cb   :  { %v3184_v8 = vpop.f32.mrf.mxu0 }
 0x5cc   :  { %2610 = vst [vmem:[#allocation2] sm:$0x3] %v2609_v7 }
 0x5cd   :  { %3418 = shalt.err (!%p3415_p4)
}
 0x5ce   :  { %2620 = dma.vmem_to_hbm [thread:$0]  %s2618_s22, 32, %s4242_s5, [#allocation3]  }
 0x5cf   :  { %3427 = dma.done.wait [#allocation3], 32  }
 0x5d0   :  { %3428 = vsyncadd [#allocation3], 4294967264 }
 0x5d1   :  { %2624 = vsyncpa [#allocation3], 1 }

</bundles_post_ra>
